<compile_context>
chip_gen: v7x
topology: tpu7x:2x2x1
jax: 0.10.0
libtpu: 0.0.40
codegen_flags: <defaults>
</compile_context>

<pallas_src>
import jax
import jax.numpy as jnp
from jax.experimental import pallas as pl
from jax.experimental.pallas import tpu as pltpu

IN_FEATURES = 28 * 28   # 784  (nn.Flatten of (1, 28, 28))
HIDDEN = 530
OUT_FEATURES = 10

# Lane-aligned padded storage shapes (zero-filled padding -> forward unchanged).
HIDDEN_PAD = 640   # 5 * 128  (hidden dim / contraction dim of Linear2)
OUT_PAD = 128      # lane-dense logits slab; sliced to 10 outside
TB_MAX = 2048      # max batch tile (per-step overhead amortization)


def _round_up(n, m):
    return (n + m - 1) // m * m


def mlp_kernel(x_ref, w1_ref, b1_ref, w2_ref, b2_ref, o_ref):
    # x_ref : (TB, 784)  f32      w1_ref: (784, 640) bf16    b1_ref: (1, 640) f32
    # w2_ref: (640, 128) bf16     b2_ref: (1, 128)   f32     o_ref : (TB, 128) bf16
    # Cast x to bf16 in-kernel (saves a separate wrapper-side HBM pass).
    x = x_ref[...].astype(jnp.bfloat16)
    # Linear 1: bf16 MXU operands, f32 accumulation.
    h = jnp.dot(x, w1_ref[...], preferred_element_type=jnp.float32)
    # Bias + ReLU epilogue in f32 (v5e-friendly; no bf16 VPU pack/unpack churn).
    h = jnp.maximum(h + b1_ref[...], 0.0)
    # Linear 2: downcast only the MXU input to bf16, accumulate in f32.
    logits = jnp.dot(h.astype(jnp.bfloat16), w2_ref[...],
                     preferred_element_type=jnp.float32)
    # bf16 logits slab halves output writeback; bias add stays in f32.
    o_ref[...] = (logits + b2_ref[...]).astype(o_ref.dtype)


def pack_params(w1, b1, w2, b2):
    """Zero-pad to lane-aligned shapes and cast weights to bf16.
    Keep this the sole packing entry point: the zero-filled W2/b2 padding is
    what guarantees logit lanes 10..127 are exactly zero."""
    w1_p = jnp.zeros((IN_FEATURES, HIDDEN_PAD), jnp.float32).at[:, :HIDDEN].set(w1)
    b1_p = jnp.zeros((1, HIDDEN_PAD), jnp.float32).at[:, :HIDDEN].set(b1)
    w2_p = jnp.zeros((HIDDEN_PAD, OUT_PAD), jnp.float32).at[:HIDDEN, :OUT_FEATURES].set(w2)
    b2_p = jnp.zeros((1, OUT_PAD), jnp.float32).at[:, :OUT_FEATURES].set(b2)
    return w1_p.astype(jnp.bfloat16), b1_p, w2_p.astype(jnp.bfloat16), b2_p


@jax.jit
def neural_network_forward(x, w1_p, b1_p, w2_p, b2_p):
    """x: (B, 1, 28, 28) float32 -> logits (B, 10) float32."""
    B = x.shape[0]
    x_flat = x.reshape(B, -1)                       # nn.Flatten
    assert x_flat.shape[1] == IN_FEATURES

    # Pad batch only to the 16-row granule (bf16 output sublane tile), NOT to a
    # multiple of TB — avoids up to TB-1 wasted rows of DMA/MXU/writeback.
    B_pad = _round_up(B, 16)
    if B_pad != B:
        x_flat = jnp.pad(x_flat, ((0, B_pad - B), (0, 0)))

    # Large batch tile amortizes per-grid-step overhead; keep >=2 grid steps so
    # v7x's two TensorCores both get work on the "parallel" batch axis.
    TB = min(TB_MAX, B_pad)
    if B_pad >= 32:
        TB = min(TB, _round_up(B_pad // 2, 16))
    num_blocks = pl.cdiv(B_pad, TB)                 # partial edge block is masked

    flops = 2 * B_pad * (IN_FEATURES * HIDDEN_PAD + HIDDEN_PAD * OUT_PAD)
    bytes_accessed = (B_pad * IN_FEATURES * 4       # x read (f32)
                      + w1_p.size * 2 + w2_p.size * 2
                      + b1_p.size * 4 + b2_p.size * 4
                      + B_pad * OUT_PAD * 2)        # bf16 logits writeback

    out = pl.pallas_call(
        mlp_kernel,
        out_shape=jax.ShapeDtypeStruct((B_pad, OUT_PAD), jnp.bfloat16),
        grid=(num_blocks,),
        in_specs=[
            pl.BlockSpec((TB, IN_FEATURES), lambda i: (i, 0)),          # x rows (f32)
            pl.BlockSpec((IN_FEATURES, HIDDEN_PAD), lambda i: (0, 0)),  # W1 (resident)
            pl.BlockSpec((1, HIDDEN_PAD), lambda i: (0, 0)),            # b1 (resident)
            pl.BlockSpec((HIDDEN_PAD, OUT_PAD), lambda i: (0, 0)),      # W2 (resident)
            pl.BlockSpec((1, OUT_PAD), lambda i: (0, 0)),               # b2 (resident)
        ],
        out_specs=pl.BlockSpec((TB, OUT_PAD), lambda i: (i, 0)),
        compiler_params=pltpu.CompilerParams(
            dimension_semantics=("parallel",),
            vmem_limit_bytes=40 * 1024 * 1024),     # keeps TB=2048 double-buffered on v5e
        cost_estimate=pl.CostEstimate(
            flops=flops, transcendentals=0, bytes_accessed=bytes_accessed),
    )(x_flat, w1_p, b1_p, w2_p, b2_p)

    # Slice back to the real batch / real logits, return f32 like the PyTorch module.
    return out[:B, :OUT_FEATURES].astype(jnp.float32)


def init_params(key):
    """Deterministic init mimicking nn.Linear's U(-1/sqrt(fan_in), 1/sqrt(fan_in)).
    Weights are stored pre-transposed as (in, out) so the kernel does x @ W."""
    k1, k2, k3, k4 = jax.random.split(key, 4)
    bound1 = 1.0 / jnp.sqrt(IN_FEATURES)
    bound2 = 1.0 / jnp.sqrt(HIDDEN)
    w1 = jax.random.uniform(k1, (IN_FEATURES, HIDDEN), jnp.float32, -bound1, bound1)
    b1 = jax.random.uniform(k2, (1, HIDDEN), jnp.float32, -bound1, bound1)
    w2 = jax.random.uniform(k3, (HIDDEN, OUT_FEATURES), jnp.float32, -bound2, bound2)
    b2 = jax.random.uniform(k4, (1, OUT_FEATURES), jnp.float32, -bound2, bound2)
    return w1, b1, w2, b2


if __name__ == "__main__":
    key = jax.random.PRNGKey(0)
    k_params, k_x = jax.random.split(key)

    w1, b1, w2, b2 = init_params(k_params)
    w1_p, b1_p, w2_p, b2_p = pack_params(w1, b1, w2, b2)

    x = jax.random.normal(k_x, (8, 1, 28, 28), jnp.float32)  # small MNIST-like batch

    logits = neural_network_forward(x, w1_p, b1_p, w2_p, b2_p)
    logits = jax.block_until_ready(logits)
    assert logits.shape == (8, OUT_FEATURES)

    x_flat = x.reshape(x.shape[0], -1)

    # Tight check: reference with the same bf16-quantized operands / bf16 output.
    def q(a):
        return a.astype(jnp.bfloat16).astype(jnp.float32)
    h_ref = jnp.maximum(q(x_flat) @ q(w1) + b1, 0.0)
    ref_bf16 = q(q(h_ref) @ q(w2) + b2)
    assert jnp.allclose(logits, ref_bf16, atol=2e-2, rtol=2e-2)

    # Loose semantic check against the full-f32 PyTorch-equivalent forward.
    ref_f32 = jnp.maximum(x_flat @ w1 + b1, 0.0) @ w2 + b2
    assert jnp.allclose(logits, ref_f32, atol=1e-1, rtol=1e-1)

    print("KERNEL_OK")
</pallas_src>

<mosaic_0001>
module attributes {stable_mosaic.version = 11 : i64} {
  func.func @mlp_kernel(%arg0: i32, %arg1: memref<16x784xf32, #tpu.memory_space<vmem>>, %arg2: memref<784x640xbf16, #tpu.memory_space<vmem>>, %arg3: memref<1x640xf32, #tpu.memory_space<vmem>>, %arg4: memref<640x128xbf16, #tpu.memory_space<vmem>>, %arg5: memref<1x128xf32, #tpu.memory_space<vmem>>, %arg6: memref<16x128xbf16, #tpu.memory_space<vmem>>) attributes {dimension_semantics = [#tpu.dimension_semantics<parallel>], iteration_bounds = array<i64: 1>, scalar_prefetch = 0 : i64, scratch_operands = 0 : i64, tpu.core_type = #tpu.core_type<tc>, window_params = [{transform_indices = @transform_0, window_bounds = array<i64: 16, 784>}, {pipeline_mode = #tpu.pipeline_mode<synchronous>, transform_indices = @transform_1, window_bounds = array<i64: 784, 640>}, {pipeline_mode = #tpu.pipeline_mode<synchronous>, transform_indices = @transform_2, window_bounds = array<i64: 1, 640>}, {pipeline_mode = #tpu.pipeline_mode<synchronous>, transform_indices = @transform_3, window_bounds = array<i64: 640, 128>}, {pipeline_mode = #tpu.pipeline_mode<synchronous>, transform_indices = @transform_4, window_bounds = array<i64: 1, 128>}, {transform_indices = @transform_5, window_bounds = array<i64: 16, 128>}]} {
    %c0 = arith.constant 0 : index
    %c0_0 = arith.constant 0 : index
    %0 = vector.load %arg1[%c0, %c0_0] : memref<16x784xf32, #tpu.memory_space<vmem>>, vector<16x784xf32>
    %1 = arith.truncf %0 : vector<16x784xf32> to vector<16x784xbf16>
    %c0_1 = arith.constant 0 : index
    %c0_2 = arith.constant 0 : index
    %2 = vector.load %arg2[%c0_1, %c0_2] : memref<784x640xbf16, #tpu.memory_space<vmem>>, vector<784x640xbf16>
    %cst = arith.constant dense<0.000000e+00> : vector<16x640xf32>
    %3 = tpu.matmul %1, %2, %cst {dimension_numbers = #tpu.dot_dimension_numbers<[1], [0], [0], [1], [0, 0, 1, 1], [], []>} : vector<16x784xbf16>, vector<784x640xbf16>, vector<16x640xf32> -> vector<16x640xf32>
    %c0_3 = arith.constant 0 : index
    %c0_4 = arith.constant 0 : index
    %4 = vector.load %arg3[%c0_3, %c0_4] : memref<1x640xf32, #tpu.memory_space<vmem>>, vector<1x640xf32>
    %5 = vector.broadcast %4 : vector<1x640xf32> to vector<16x640xf32>
    %6 = arith.addf %3, %5 : vector<16x640xf32>
    %cst_5 = arith.constant 0.000000e+00 : f32
    %7 = vector.broadcast %cst_5 : f32 to vector<16x640xf32>
    %8 = arith.maximumf %6, %7 : vector<16x640xf32>
    %9 = arith.truncf %8 : vector<16x640xf32> to vector<16x640xbf16>
    %c0_6 = arith.constant 0 : index
    %c0_7 = arith.constant 0 : index
    %10 = vector.load %arg4[%c0_6, %c0_7] : memref<640x128xbf16, #tpu.memory_space<vmem>>, vector<640x128xbf16>
    %cst_8 = arith.constant dense<0.000000e+00> : vector<16x128xf32>
    %11 = tpu.matmul %9, %10, %cst_8 {dimension_numbers = #tpu.dot_dimension_numbers<[1], [0], [0], [1], [0, 0, 1, 1], [], []>} : vector<16x640xbf16>, vector<640x128xbf16>, vector<16x128xf32> -> vector<16x128xf32>
    %c0_9 = arith.constant 0 : index
    %c0_10 = arith.constant 0 : index
    %12 = vector.load %arg5[%c0_9, %c0_10] : memref<1x128xf32, #tpu.memory_space<vmem>>, vector<1x128xf32>
    %13 = vector.broadcast %12 : vector<1x128xf32> to vector<16x128xf32>
    %14 = arith.addf %11, %13 : vector<16x128xf32>
    %15 = arith.truncf %14 : vector<16x128xf32> to vector<16x128xbf16>
    %c0_11 = arith.constant 0 : index
    %c0_12 = arith.constant 0 : index
    %16 = vector.load %arg6[%c0_11, %c0_12] : memref<16x128xbf16, #tpu.memory_space<vmem>>, vector<16x128xbf16>
    tpu.vector_store %arg6[%c0_11, %c0_12], %15 {strides = array<i32>} : memref<16x128xbf16, #tpu.memory_space<vmem>>, vector<16x128xbf16>,
    return
  }
  func.func @transform_0(%arg0: i32) -> (i32, i32) {
    %c0_i32 = arith.constant 0 : i32
    %c0_i32_0 = arith.constant 0 : i32
    return %arg0, %c0_i32 : i32, i32
  }
  func.func @transform_1(%arg0: i32) -> (i32, i32) {
    %c0_i32 = arith.constant 0 : i32
    %c0_i32_0 = arith.constant 0 : i32
    %c0_i32_1 = arith.constant 0 : i32
    return %c0_i32, %c0_i32_0 : i32, i32
  }
  func.func @transform_2(%arg0: i32) -> (i32, i32) {
    %c0_i32 = arith.constant 0 : i32
    %c0_i32_0 = arith.constant 0 : i32
    %c0_i32_1 = arith.constant 0 : i32
    return %c0_i32, %c0_i32_0 : i32, i32
  }
  func.func @transform_3(%arg0: i32) -> (i32, i32) {
    %c0_i32 = arith.constant 0 : i32
    %c0_i32_0 = arith.constant 0 : i32
    %c0_i32_1 = arith.constant 0 : i32
    return %c0_i32, %c0_i32_0 : i32, i32
  }
  func.func @transform_4(%arg0: i32) -> (i32, i32) {
    %c0_i32 = arith.constant 0 : i32
    %c0_i32_0 = arith.constant 0 : i32
    %c0_i32_1 = arith.constant 0 : i32
    return %c0_i32, %c0_i32_0 : i32, i32
  }
  func.func @transform_5(%arg0: i32) -> (i32, i32) {
    %c0_i32 = arith.constant 0 : i32
    %c0_i32_0 = arith.constant 0 : i32
    return %arg0, %c0_i32 : i32, i32
  }
}

</mosaic_0001>

<bundles_post_ra>
// kernel: neural_network_forward.1
= control target key start
LH: loop header
LB: loop body
LE: loop exit
PB: predicated region body
PF: predicated region fallthrough
CT: control target
= control target key end

     0   :  { %10 = vsyncpa [#allocation3], 0  ;;  %s3533_s18 = smov [#allocation2]   ;;  %s3803_s0 = inlined_call_operand.vmem [shape: f32[16,784], index: 0, kind: input, shape index: {}]   ;;  %s3804_s1 = inlined_call_operand.hbm [shape: bf16[784,640], index: 1, kind: input, shape index: {}]   ;;  %s3805_s2 = inlined_call_operand.vmem [shape: f32[1,640], index: 2, kind: input, shape index: {}]   ;;  %s3806_s3 = inlined_call_operand.vmem [shape: bf16[640,128], index: 3, kind: input, shape index: {}]   ;;  %s3807_s4 = inlined_call_operand.vmem [shape: f32[1,128], index: 4, kind: input, shape index: {}]   ;;  %s3808_s5 = inlined_call_operand.vmem [shape: bf16[16,128], index: 5, kind: output, shape index: {}]  }
   0x1   :  { %s18_s19 = sshll.u32 %s3533_s18, 4  ;;  %s3509_s22 = scalar_lea.hbm %s3804_s1, 31360  ;;  %s19_s19 = int_to_ptr.vmem [resolvable:$true] %s18_s19 }
   0x2   :  { %p3510_p0 = scmp.ne.s32.totalorder %s3804_s1, %s3509_s22  ;;  %p3513_p1 = scmp.lt.u32.totalorder %s3509_s22, %s3804_s1 }
   0x4   :  { %p3515_p2 = pnand %p3513_p1, %p3510_p0 }
   0x6   :  { %3518 = shalt.err (!%p3515_p2)
}
   0x7   :  { %s3519_s27 = scalar_lea.vmem %s19_s19, 31360  ;;  %p3524_p4 = scmp.lt.s32.totalorder %s19_s19, %s19_s19 }
   0x8   :  { %p3520_p3 = scmp.ne.s32.totalorder %s19_s19, %s3519_s27  ;;  %p3525_p5 = scmp.lt.s32.totalorder %s3519_s27, %s3519_s27 }
   0xa   :  { %p3526_p6 = por %p3525_p5, %p3524_p4 }
   0xc   :  { %p3527_p7 = pnand %p3526_p6, %p3520_p3 }
   0xe   :  { %3530 = shalt.err (!%p3527_p7)
}
   0xf   :  { %s3534_s28 = smov 320   ;;  %s3535_s29 = smov 20  }
  0x10   :  { %24 = dma.hbm_to_vmem [thread:$0]  %s3804_s1, 31360, %s19_s19, [#allocation3], %s3534_s28, %s3534_s28, %s3535_s29  }
  0x11   :  { %3531 = dma.done.wait [#allocation3], 31360  }
  0x12   :  { %3532 = vsyncadd [#allocation3], 4294935936  ;;  %v3126_v0 = vld [vmem:[#allocation2 + $0x4] ss:$20 sps:$4 sm:$0xff]   ;;  %v3128_v1 = vld [vmem:[#allocation2 + $0xc] ss:$20 sps:$4 sm:$0xff]  }
  0x13   :  { %1655 = vmatprep.subr.bf16.mxu0 %v3126_v0  ;;  %v3130_v2 = vld [vmem:[#allocation2] ss:$20 sps:$4 sm:$0xff]   ;;  %v3131_v3 = vld [vmem:[#allocation2 + $0x8] ss:$20 sps:$4 sm:$0xff]   ;;  %1827 = vmatprep.subr.bf16.mxu1 %v3128_v1  ;;  %v3137_v7 = vld [vmem:[#allocation2 + $0x30] ss:$20 sps:$4 sm:$0xff]  }
  0x14   :  { %v3132_v4 = vld [vmem:[#allocation2 + $0x2c] ss:$20 sps:$4 sm:$0xff]   ;;  %1656 = vmatpush1.bf16.msra.mxu0 %v3130_v2  ;;  %1828 = vmatpush1.bf16.msra.mxu1 %v3131_v3  ;;  %v3134_v5 = vld [vmem:[#allocation2 + $0x34] ss:$20 sps:$4 sm:$0xff]   ;;  %v3140_v9 = vld [vmem:[#allocation2 + $0x5c] ss:$20 sps:$4 sm:$0xff]  }
  0x15   :  { %v3136_v6 = vld [vmem:[#allocation2 + $0x28] ss:$20 sps:$4 sm:$0xff]   ;;  %1657 = vmatprep.subr.bf16.mxu0 %v3132_v4  ;;  %1829 = vmatprep.subr.bf16.mxu1 %v3134_v5  ;;  %v3142_v10 = vld [vmem:[#allocation2 + $0x50] ss:$20 sps:$4 sm:$0xff]   ;;  %v3143_v11 = vld [vmem:[#allocation2 + $0x58] ss:$20 sps:$4 sm:$0xff]  }
  0x16   :  { %v3138_v8 = vld [vmem:[#allocation2 + $0x54] ss:$20 sps:$4 sm:$0xff]   ;;  %v3144_v12 = vld [vmem:[#allocation2 + $0x7c] ss:$20 sps:$4 sm:$0xff]   ;;  %v3146_v13 = vld [vmem:[#allocation2 + $0x84] ss:$20 sps:$4 sm:$0xff]  }
  0x17   :  { %v3148_v14 = vld [vmem:[#allocation2 + $0x78] ss:$20 sps:$4 sm:$0xff]   ;;  %v3149_v15 = vld [vmem:[#allocation2 + $0x80] ss:$20 sps:$4 sm:$0xff]   ;;  %v3155_v19 = vld [vmem:[#allocation2 + $0xa8] ss:$20 sps:$4 sm:$0xff]  }
  0x18   :  { %1658 = vmatpush1.bf16.msra.mxu0 %v3136_v6  ;;  %1830 = vmatpush1.bf16.msra.mxu1 %v3137_v7  ;;  %v3150_v16 = vld [vmem:[#allocation2 + $0xa4] ss:$20 sps:$4 sm:$0xff]   ;;  %v3152_v17 = vld [vmem:[#allocation2 + $0xac] ss:$20 sps:$4 sm:$0xff]   ;;  %v3158_v21 = vld [vmem:[#allocation2 + $0xd4] ss:$20 sps:$4 sm:$0xff]  }
  0x19   :  { %1659 = vmatprep.subr.bf16.mxu0 %v3138_v8  ;;  %1831 = vmatprep.subr.bf16.mxu1 %v3140_v9  ;;  %v3154_v18 = vld [vmem:[#allocation2 + $0xa0] ss:$20 sps:$4 sm:$0xff]   ;;  %v3160_v22 = vld [vmem:[#allocation2 + $0xc8] ss:$20 sps:$4 sm:$0xff]   ;;  %v3161_v23 = vld [vmem:[#allocation2 + $0xd0] ss:$20 sps:$4 sm:$0xff]  }
  0x1a   :  { %v3156_v20 = vld [vmem:[#allocation2 + $0xcc] ss:$20 sps:$4 sm:$0xff]   ;;  %v3162_v24 = vld [vmem:[#allocation2 + $0xf4] ss:$20 sps:$4 sm:$0xff]   ;;  %v3164_v25 = vld [vmem:[#allocation2 + $0xfc] ss:$20 sps:$4 sm:$0xff]  }
  0x1b   :  { %v3166_v26 = vld [vmem:[#allocation2 + $0xf0] ss:$20 sps:$4 sm:$0xff]   ;;  %v3167_v27 = vld [vmem:[#allocation2 + $0xf8] ss:$20 sps:$4 sm:$0xff]   ;;  %v3173_v31 = vld [vmem:[#allocation2 + $0x120] ss:$20 sps:$4 sm:$0xff]  }
  0x1c   :  { %1660 = vmatpush1.bf16.msra.mxu0 %v3142_v10  ;;  %1832 = vmatpush1.bf16.msra.mxu1 %v3143_v11  ;;  %v3168_v28 = vld [vmem:[#allocation2 + $0x11c] ss:$20 sps:$4 sm:$0xff]   ;;  %v3170_v29 = vld [vmem:[#allocation2 + $0x124] ss:$20 sps:$4 sm:$0xff]   ;;  %v3176_v33 = vld [vmem:[#allocation2 + $0x14c] ss:$20 sps:$4 sm:$0xff]  }
  0x1d   :  { %1661 = vmatprep.subr.bf16.mxu0 %v3144_v12  ;;  %1833 = vmatprep.subr.bf16.mxu1 %v3146_v13  ;;  %v3172_v30 = vld [vmem:[#allocation2 + $0x118] ss:$20 sps:$4 sm:$0xff]   ;;  %v3178_v34 = vld [vmem:[#allocation2 + $0x140] ss:$20 sps:$4 sm:$0xff]   ;;  %v3179_v35 = vld [vmem:[#allocation2 + $0x148] ss:$20 sps:$4 sm:$0xff]  }
  0x1e   :  { %v3174_v32 = vld [vmem:[#allocation2 + $0x144] ss:$20 sps:$4 sm:$0xff]   ;;  %v3180_v36 = vld [vmem:[#allocation2 + $0x16c] ss:$20 sps:$4 sm:$0xff]   ;;  %v3182_v37 = vld [vmem:[#allocation2 + $0x174] ss:$20 sps:$4 sm:$0xff]  }
  0x1f   :  { %v3184_v38 = vld [vmem:[#allocation2 + $0x168] ss:$20 sps:$4 sm:$0xff]   ;;  %v3185_v39 = vld [vmem:[#allocation2 + $0x170] ss:$20 sps:$4 sm:$0xff]   ;;  %v3191_v43 = vld [vmem:[#allocation2 + $0x198] ss:$20 sps:$4 sm:$0xff]  }
  0x20   :  { %1662 = vmatpush1.bf16.msra.mxu0 %v3148_v14  ;;  %1834 = vmatpush1.bf16.msra.mxu1 %v3149_v15  ;;  %v3186_v40 = vld [vmem:[#allocation2 + $0x194] ss:$20 sps:$4 sm:$0xff]   ;;  %v3188_v41 = vld [vmem:[#allocation2 + $0x19c] ss:$20 sps:$4 sm:$0xff]   ;;  %v3194_v45 = vld [vmem:[#allocation2 + $0x1c4] ss:$20 sps:$4 sm:$0xff]  }
  0x21   :  { %1663 = vmatprep.subr.bf16.mxu0 %v3150_v16  ;;  %1835 = vmatprep.subr.bf16.mxu1 %v3152_v17  ;;  %v3190_v42 = vld [vmem:[#allocation2 + $0x190] ss:$20 sps:$4 sm:$0xff]   ;;  %v36_v46 = vld [vmem:[%s3803_s0 + $0x8] sm:$0xff]  ;;  %v3197_v49 = vld [vmem:[#allocation2 + $0x1c0] ss:$20 sps:$4 sm:$0xff]   ;;  %vm1651_vm0 = vcmask 130048  }
  0x22   :  { %v3192_v44 = vld [vmem:[#allocation2 + $0x1bc] ss:$20 sps:$4 sm:$0xff]   ;;  %v43_v47 = vld [vmem:[%s3803_s0 + $0x40] sm:$0xff]  ;;  %v3196_v48 = vld [vmem:[#allocation2 + $0x1b8] ss:$20 sps:$4 sm:$0xff]   ;;  %vm3538_vm1 = vmmov 0  }
  0x23   :  { %v3587_v50 = vpack.c.bf16 %v43_v47, %v36_v46  ;;  %v3198_v51 = vld [vmem:[#allocation2 + $0x1e4] ss:$20 sps:$4 sm:$0xff]   ;;  %v3200_v52 = vld [vmem:[#allocation2 + $0x1ec] ss:$20 sps:$4 sm:$0xff]   ;;  %v3203_v54 = vld [vmem:[#allocation2 + $0x1e8] ss:$20 sps:$4 sm:$0xff]  }
  0x24   :  { %1664 = vmatpush1.bf16.msra.mxu0 %v3154_v18  ;;  %1836 = vmatpush1.bf16.msra.mxu1 %v3155_v19  ;;  %v3202_v53 = vld [vmem:[#allocation2 + $0x1e0] ss:$20 sps:$4 sm:$0xff]   ;;  %v3208_v57 = vld [vmem:[#allocation2 + $0x208] ss:$20 sps:$4 sm:$0xff]   ;;  %v3209_v58 = vld [vmem:[#allocation2 + $0x210] ss:$20 sps:$4 sm:$0xff]  }
  0x25   :  { %1665 = vmatprep.subr.bf16.mxu0 %v3156_v20  ;;  %1837 = vmatprep.subr.bf16.mxu1 %v3158_v21  ;;  %v3204_v55 = vld [vmem:[#allocation2 + $0x20c] ss:$20 sps:$4 sm:$0xff]   ;;  %v3206_v56 = vld [vmem:[#allocation2 + $0x214] ss:$20 sps:$4 sm:$0xff]   ;;  %v3212_v60 = vld [vmem:[#allocation2 + $0x23c] ss:$20 sps:$4 sm:$0xff]  }
  0x26   :  { %1687 = vmatprep.mubr.bf16.mxu0 %v3587_v50  ;;  %1859 = vmatprep.mubr.bf16.mxu1 %v3587_v50  ;;  %v3210_v59 = vld [vmem:[#allocation2 + $0x234] ss:$20 sps:$4 sm:$0xff]   ;;  %v3214_v61 = vld [vmem:[#allocation2 + $0x230] ss:$20 sps:$4 sm:$0xff]   ;;  %v3215_v62 = vld [vmem:[#allocation2 + $0x238] ss:$20 sps:$4 sm:$0xff]  }
  0x27   :  { %v3216_v63 = vld [vmem:[#allocation2 + $0x25c] ss:$20 sps:$4 sm:$0xff]   ;;  %v3218_v0 = vld [vmem:[#allocation2 + $0x264] ss:$20 sps:$4 sm:$0xff]   ;;  %v3221_v2 = vld [vmem:[#allocation2 + $0x260] ss:$20 sps:$4 sm:$0xff]  }
  0x28   :  { %1666 = vmatpush1.bf16.msra.mxu0 %v3160_v22  ;;  %1838 = vmatpush1.bf16.msra.mxu1 %v3161_v23  ;;  %v3220_v1 = vld [vmem:[#allocation2 + $0x258] ss:$20 sps:$4 sm:$0xff]   ;;  %v35_v4 = vld [vmem:[%s3803_s0] sm:$0xff]  ;;  %v3225_v8 = vld [vmem:[#allocation2 + $0x288] ss:$20 sps:$4 sm:$0xff]  }
  0x29   :  { %1667 = vmatprep.subr.bf16.mxu0 %v3162_v24  ;;  %1839 = vmatprep.subr.bf16.mxu1 %v3164_v25  ;;  %v3224_v3 = vld [vmem:[#allocation2 + $0x284] ss:$20 sps:$4 sm:$0xff]   ;;  %v3227_v6 = vld [vmem:[#allocation2 + $0x28c] ss:$20 sps:$4 sm:$0xff]   ;;  %v3233_v11 = vld [vmem:[#allocation2 + $0x2b4] ss:$20 sps:$4 sm:$0xff]  }
  0x2a   :  { %v42_v5 = vld [vmem:[%s3803_s0 + $0x38] sm:$0xff]  ;;  %v3222_v7 = vld [vmem:[#allocation2 + $0x280] ss:$20 sps:$4 sm:$0xff]   ;;  %v3231_v13 = vld [vmem:[#allocation2 + $0x2b0] ss:$20 sps:$4 sm:$0xff]  }
  0x2b   :  { %v3597_v9 = vpack.c.bf16 %v42_v5, %v35_v4  ;;  %v3230_v10 = vld [vmem:[#allocation2 + $0x2ac] ss:$20 sps:$4 sm:$0xff]   ;;  %v3228_v12 = vld [vmem:[#allocation2 + $0x2a8] ss:$20 sps:$4 sm:$0xff]   ;;  %v3234_v16 = vld [vmem:[#allocation2 + $0x2d0] ss:$20 sps:$4 sm:$0xff]  }
  0x2c   :  { %1668 = vmatpush1.bf16.msra.mxu0 %v3166_v26  ;;  %1840 = vmatpush1.bf16.msra.mxu1 %v3167_v27  ;;  %v3236_v14 = vld [vmem:[#allocation2 + $0x2d4] ss:$20 sps:$4 sm:$0xff]   ;;  %v3239_v15 = vld [vmem:[#allocation2 + $0x2dc] ss:$20 sps:$4 sm:$0xff]   ;;  %v3237_v17 = vld [vmem:[#allocation2 + $0x2d8] ss:$20 sps:$4 sm:$0xff]  }
  0x2d   :  { %1669 = vmatprep.subr.bf16.mxu0 %v3168_v28  ;;  %1841 = vmatprep.subr.bf16.mxu1 %v3170_v29  ;;  %v3242_v18 = vld [vmem:[#allocation2 + $0x2fc] ss:$20 sps:$4 sm:$0xff]   ;;  %v3245_v19 = vld [vmem:[#allocation2 + $0x304] ss:$20 sps:$4 sm:$0xff]   ;;  %v3243_v21 = vld [vmem:[#allocation2 + $0x300] ss:$20 sps:$4 sm:$0xff]  }
  0x2e   :  { %v3240_v20 = vld [vmem:[#allocation2 + $0x2f8] ss:$20 sps:$4 sm:$0xff]   ;;  %v3246_v24 = vld [vmem:[#allocation2 + $0x320] ss:$20 sps:$4 sm:$0xff]   ;;  %v3249_v25 = vld [vmem:[#allocation2 + $0x328] ss:$20 sps:$4 sm:$0xff]  }
  0x2f   :  { %v3248_v22 = vld [vmem:[#allocation2 + $0x324] ss:$20 sps:$4 sm:$0xff]   ;;  %v3251_v23 = vld [vmem:[#allocation2 + $0x32c] ss:$20 sps:$4 sm:$0xff]   ;;  %v3257_v27 = vld [vmem:[#allocation2 + $0x354] ss:$20 sps:$4 sm:$0xff]  }
  0x30   :  { %1670 = vmatpush1.bf16.msra.mxu0 %v3172_v30  ;;  %1842 = vmatpush1.bf16.msra.mxu1 %v3173_v31  ;;  %v3254_v26 = vld [vmem:[#allocation2 + $0x34c] ss:$20 sps:$4 sm:$0xff]   ;;  %v3252_v28 = vld [vmem:[#allocation2 + $0x348] ss:$20 sps:$4 sm:$0xff]   ;;  %v3255_v29 = vld [vmem:[#allocation2 + $0x350] ss:$20 sps:$4 sm:$0xff]  }
  0x31   :  { %1671 = vmatprep.subr.bf16.mxu0 %v3174_v32  ;;  %1843 = vmatprep.subr.bf16.mxu1 %v3176_v33  ;;  %v3260_v30 = vld [vmem:[#allocation2 + $0x374] ss:$20 sps:$4 sm:$0xff]   ;;  %v3263_v31 = vld [vmem:[#allocation2 + $0x37c] ss:$20 sps:$4 sm:$0xff]   ;;  %v3309_v5 = vld [vmem:[#allocation2 + $0x4b8] ss:$20 sps:$4 sm:$0xff]  }
  0x32   :  { %v38_v32 = vld [vmem:[%s3803_s0 + $0x18] sm:$0xff]  ;;  %v45_v33 = vld [vmem:[%s3803_s0 + $0x50] sm:$0xff] }
  0x33   :  { %v3281_v46 = vld [vmem:[#allocation2 + $0x3f4] ss:$20 sps:$4 sm:$0xff]   ;;  %v3306_v4 = vld [vmem:[#allocation2 + $0x4b0] ss:$20 sps:$4 sm:$0xff]  }
  0x34   :  { %1672 = vmatpush1.bf16.msra.mxu0 %v3178_v34  ;;  %1844 = vmatpush1.bf16.msra.mxu1 %v3179_v35  ;;  %v3258_v34 = vld [vmem:[#allocation2 + $0x370] ss:$20 sps:$4 sm:$0xff]   ;;  %v3261_v35 = vld [vmem:[#allocation2 + $0x378] ss:$20 sps:$4 sm:$0xff]   ;;  %v3276_v47 = vld [vmem:[#allocation2 + $0x3e8] ss:$20 sps:$4 sm:$0xff]  }
  0x35   :  { %1673 = vmatprep.subr.bf16.mxu0 %v3180_v36  ;;  %1845 = vmatprep.subr.bf16.mxu1 %v3182_v37  ;;  %v3607_v36 = vpack.c.bf16 %v45_v33, %v38_v32  ;;  %v3266_v37 = vld [vmem:[#allocation2 + $0x39c] ss:$20 sps:$4 sm:$0xff]   ;;  %v3339_v32 = vld [vmem:[#allocation2 + $0x580] ss:$20 sps:$4 sm:$0xff]   ;;  %v3344_v33 = vld [vmem:[#allocation2 + $0x5a4] ss:$20 sps:$4 sm:$0xff]  }
  0x38   :  { %1674 = vmatpush1.bf16.msra.mxu0 %v3184_v38  ;;  %1846 = vmatpush1.bf16.msra.mxu1 %v3185_v39  ;;  %v3269_v38 = vld [vmem:[#allocation2 + $0x3a4] ss:$20 sps:$4 sm:$0xff]  }
  0x39   :  { %1675 = vmatprep.subr.bf16.mxu0 %v3186_v40  ;;  %1847 = vmatprep.subr.bf16.mxu1 %v3188_v41  ;;  %v3264_v39 = vld [vmem:[#allocation2 + $0x398] ss:$20 sps:$4 sm:$0xff]   ;;  %v3267_v40 = vld [vmem:[#allocation2 + $0x3a0] ss:$20 sps:$4 sm:$0xff]  }
  0x3a   :  { %v3272_v41 = vld [vmem:[#allocation2 + $0x3c4] ss:$20 sps:$4 sm:$0xff]  }
  0x3c   :  { %1676 = vmatpush1.bf16.msra.mxu0 %v3190_v42  ;;  %1848 = vmatpush1.bf16.msra.mxu1 %v3191_v43  ;;  %v3275_v42 = vld [vmem:[#allocation2 + $0x3cc] ss:$20 sps:$4 sm:$0xff]  }
  0x3d   :  { %1677 = vmatprep.subr.bf16.mxu0 %v3192_v44  ;;  %1849 = vmatprep.subr.bf16.mxu1 %v3194_v45  ;;  %v3270_v43 = vld [vmem:[#allocation2 + $0x3c0] ss:$20 sps:$4 sm:$0xff]   ;;  %v3273_v44 = vld [vmem:[#allocation2 + $0x3c8] ss:$20 sps:$4 sm:$0xff]  }
  0x3e   :  { %v3278_v45 = vld [vmem:[#allocation2 + $0x3ec] ss:$20 sps:$4 sm:$0xff]  }
  0x40   :  { %1678 = vmatpush1.bf16.msra.mxu0 %v3196_v48  ;;  %1850 = vmatpush1.bf16.msra.mxu1 %v3197_v49  ;;  %v3279_v48 = vld [vmem:[#allocation2 + $0x3f0] ss:$20 sps:$4 sm:$0xff]   ;;  %v3284_v49 = vld [vmem:[#allocation2 + $0x414] ss:$20 sps:$4 sm:$0xff]  }
  0x41   :  { %1679 = vmatprep.subr.bf16.mxu0 %v3198_v51  ;;  %1851 = vmatprep.subr.bf16.mxu1 %v3200_v52  ;;  %v3287_v51 = vld [vmem:[#allocation2 + $0x41c] ss:$20 sps:$4 sm:$0xff]  }
  0x42   :  { %v3282_v52 = vld [vmem:[#allocation2 + $0x410] ss:$20 sps:$4 sm:$0xff]  }
  0x44   :  { %1680 = vmatpush1.bf16.msra.mxu0 %v3202_v53  ;;  %1852 = vmatpush1.bf16.msra.mxu1 %v3203_v54  ;;  %v3285_v53 = vld [vmem:[#allocation2 + $0x418] ss:$20 sps:$4 sm:$0xff]   ;;  %v3290_v54 = vld [vmem:[#allocation2 + $0x43c] ss:$20 sps:$4 sm:$0xff]  }
  0x45   :  { %1681 = vmatprep.subr.bf16.mxu0 %v3204_v55  ;;  %1853 = vmatprep.subr.bf16.mxu1 %v3206_v56  ;;  %v3293_v55 = vld [vmem:[#allocation2 + $0x444] ss:$20 sps:$4 sm:$0xff]  }
  0x46   :  { %v3288_v56 = vld [vmem:[#allocation2 + $0x438] ss:$20 sps:$4 sm:$0xff]  }
  0x48   :  { %1682 = vmatpush1.bf16.msra.mxu0 %v3208_v57  ;;  %1854 = vmatpush1.bf16.msra.mxu1 %v3209_v58  ;;  %v3291_v57 = vld [vmem:[#allocation2 + $0x440] ss:$20 sps:$4 sm:$0xff]   ;;  %v3296_v58 = vld [vmem:[#allocation2 + $0x464] ss:$20 sps:$4 sm:$0xff]  }
  0x49   :  { %1683 = vmatprep.subr.bf16.mxu0 %v3210_v59  ;;  %1855 = vmatprep.subr.bf16.mxu1 %v3212_v60  ;;  %v3299_v59 = vld [vmem:[#allocation2 + $0x46c] ss:$20 sps:$4 sm:$0xff]  }
  0x4a   :  { %v3294_v60 = vld [vmem:[#allocation2 + $0x460] ss:$20 sps:$4 sm:$0xff]  }
  0x4c   :  { %1684 = vmatpush1.bf16.msra.mxu0 %v3214_v61  ;;  %1856 = vmatpush1.bf16.msra.mxu1 %v3215_v62  ;;  %v3297_v61 = vld [vmem:[#allocation2 + $0x468] ss:$20 sps:$4 sm:$0xff]   ;;  %v3302_v62 = vld [vmem:[#allocation2 + $0x48c] ss:$20 sps:$4 sm:$0xff]  }
  0x4d   :  { %1685 = vmatprep.subr.bf16.mxu0 %v3216_v63  ;;  %1857 = vmatprep.subr.bf16.mxu1 %v3218_v0  ;;  %v3305_v63 = vld [vmem:[#allocation2 + $0x494] ss:$20 sps:$4 sm:$0xff]  }
  0x4e   :  { %v3300_v0 = vld [vmem:[#allocation2 + $0x488] ss:$20 sps:$4 sm:$0xff]  }
  0x50   :  { %1686 = vmatpush1.bf16.msra.mxu0 %v3220_v1  ;;  %1858 = vmatpush1.bf16.msra.mxu1 %v3221_v2  ;;  %v3303_v1 = vld [vmem:[#allocation2 + $0x490] ss:$20 sps:$4 sm:$0xff]   ;;  %v3308_v2 = vld [vmem:[#allocation2 + $0x4b4] ss:$20 sps:$4 sm:$0xff]  }
  0x51   :  { %1698 = vmatprep.subr.bf16.mxu0 %v3224_v3  ;;  %1870 = vmatprep.subr.bf16.mxu1 %v3227_v6  ;;  %v3311_v3 = vld [vmem:[#allocation2 + $0x4bc] ss:$20 sps:$4 sm:$0xff]  }
  0x52   :  { %v3314_v6 = vld [vmem:[#allocation2 + $0x4dc] ss:$20 sps:$4 sm:$0xff]  }
  0x53   :  { %1688 = vmatmul.mubr.bf16.vlgmr.msra.gmra.mrb[0].mxu0 %v3597_v9  ;;  %1860 = vmatmul.mubr.bf16.vlgmr.msra.gmra.mrb[0].mxu1 %v3597_v9 }
  0x54   :  { %1699 = vmatpush1.bf16.msra.mxu0 %v3222_v7  ;;  %1871 = vmatpush1.bf16.msra.mxu1 %v3225_v8  ;;  %v3317_v7 = vld [vmem:[#allocation2 + $0x4e4] ss:$20 sps:$4 sm:$0xff]  }
  0x55   :  { %1700 = vmatprep.subr.bf16.mxu0 %v3230_v10  ;;  %1872 = vmatprep.subr.bf16.mxu1 %v3233_v11  ;;  %v3312_v8 = vld [vmem:[#allocation2 + $0x4d8] ss:$20 sps:$4 sm:$0xff]   ;;  %v3315_v10 = vld [vmem:[#allocation2 + $0x4e0] ss:$20 sps:$4 sm:$0xff]  }
  0x56   :  { %1730 = vmatprep.mubr.bf16.mxu0 %v3607_v36  ;;  %1902 = vmatprep.mubr.bf16.mxu1 %v3607_v36  ;;  %v3320_v11 = vld [vmem:[#allocation2 + $0x504] ss:$20 sps:$4 sm:$0xff]  }
  0x58   :  { %1701 = vmatpush1.bf16.msra.mxu0 %v3228_v12  ;;  %1873 = vmatpush1.bf16.msra.mxu1 %v3231_v13  ;;  %v37_v12 = vld [vmem:[%s3803_s0 + $0x10] sm:$0xff]  ;;  %v44_v13 = vld [vmem:[%s3803_s0 + $0x48] sm:$0xff] }
  0x59   :  { %1702 = vmatprep.subr.bf16.mxu0 %v3236_v14  ;;  %1874 = vmatprep.subr.bf16.mxu1 %v3239_v15  ;;  %v3323_v14 = vld [vmem:[#allocation2 + $0x50c] ss:$20 sps:$4 sm:$0xff]  }
  0x5a   :  { %v3318_v15 = vld [vmem:[#allocation2 + $0x500] ss:$20 sps:$4 sm:$0xff]  }
  0x5c   :  { %1703 = vmatpush1.bf16.msra.mxu0 %v3234_v16  ;;  %1875 = vmatpush1.bf16.msra.mxu1 %v3237_v17  ;;  %v3321_v16 = vld [vmem:[#allocation2 + $0x508] ss:$20 sps:$4 sm:$0xff]   ;;  %v3617_v17 = vpack.c.bf16 %v44_v13, %v37_v12 }
  0x5d   :  { %1704 = vmatprep.subr.bf16.mxu0 %v3242_v18  ;;  %1876 = vmatprep.subr.bf16.mxu1 %v3245_v19  ;;  %v3326_v18 = vld [vmem:[#allocation2 + $0x52c] ss:$20 sps:$4 sm:$0xff]   ;;  %v3329_v19 = vld [vmem:[#allocation2 + $0x534] ss:$20 sps:$4 sm:$0xff]   ;;  %v3407_v13 = vld [vmem:[#allocation2 + $0x73c] ss:$20 sps:$4 sm:$0xff]  }
  0x5e   :  { %v3404_v12 = vld [vmem:[#allocation2 + $0x734] ss:$20 sps:$4 sm:$0xff]  }
  0x60   :  { %1705 = vmatpush1.bf16.msra.mxu0 %v3240_v20  ;;  %1877 = vmatpush1.bf16.msra.mxu1 %v3243_v21  ;;  %v40_v20 = vld [vmem:[%s3803_s0 + $0x28] sm:$0xff] }
  0x61   :  { %1706 = vmatprep.subr.bf16.mxu0 %v3248_v22  ;;  %1878 = vmatprep.subr.bf16.mxu1 %v3251_v23  ;;  %v3324_v21 = vld [vmem:[#allocation2 + $0x528] ss:$20 sps:$4 sm:$0xff]   ;;  %v3327_v22 = vld [vmem:[#allocation2 + $0x530] ss:$20 sps:$4 sm:$0xff]  }
  0x62   :  { %v47_v23 = vld [vmem:[%s3803_s0 + $0x60] sm:$0xff] }
  0x64   :  { %1707 = vmatpush1.bf16.msra.mxu0 %v3246_v24  ;;  %1879 = vmatpush1.bf16.msra.mxu1 %v3249_v25  ;;  %v3332_v24 = vld [vmem:[#allocation2 + $0x554] ss:$20 sps:$4 sm:$0xff]   ;;  %v3627_v25 = vpack.c.bf16 %v47_v23, %v40_v20  ;;  %v3416_v23 = vld [vmem:[#allocation2 + $0x784] ss:$20 sps:$4 sm:$0xff]  }
  0x65   :  { %1708 = vmatprep.subr.bf16.mxu0 %v3254_v26  ;;  %1880 = vmatprep.subr.bf16.mxu1 %v3257_v27  ;;  %v3335_v26 = vld [vmem:[#allocation2 + $0x55c] ss:$20 sps:$4 sm:$0xff]   ;;  %v3411_v20 = vld [vmem:[#allocation2 + $0x760] ss:$20 sps:$4 sm:$0xff]  }
  0x66   :  { %v3330_v27 = vld [vmem:[#allocation2 + $0x550] ss:$20 sps:$4 sm:$0xff]  }
  0x68   :  { %1709 = vmatpush1.bf16.msra.mxu0 %v3252_v28  ;;  %1881 = vmatpush1.bf16.msra.mxu1 %v3255_v29  ;;  %v3333_v28 = vld [vmem:[#allocation2 + $0x558] ss:$20 sps:$4 sm:$0xff]   ;;  %v3338_v29 = vld [vmem:[#allocation2 + $0x57c] ss:$20 sps:$4 sm:$0xff]  }
  0x69   :  { %1710 = vmatprep.subr.bf16.mxu0 %v3260_v30  ;;  %1882 = vmatprep.subr.bf16.mxu1 %v3263_v31  ;;  %v3341_v30 = vld [vmem:[#allocation2 + $0x584] ss:$20 sps:$4 sm:$0xff]  }
  0x6a   :  { %v3336_v31 = vld [vmem:[#allocation2 + $0x578] ss:$20 sps:$4 sm:$0xff]  }
  0x6c   :  { %1711 = vmatpush1.bf16.msra.mxu0 %v3258_v34  ;;  %1883 = vmatpush1.bf16.msra.mxu1 %v3261_v35  ;;  %v3347_v34 = vld [vmem:[#allocation2 + $0x5ac] ss:$20 sps:$4 sm:$0xff]  }
  0x6d   :  { %1712 = vmatprep.subr.bf16.mxu0 %v3266_v37  ;;  %1884 = vmatprep.subr.bf16.mxu1 %v3269_v38  ;;  %v3342_v35 = vld [vmem:[#allocation2 + $0x5a0] ss:$20 sps:$4 sm:$0xff]   ;;  %v3345_v37 = vld [vmem:[#allocation2 + $0x5a8] ss:$20 sps:$4 sm:$0xff]  }
  0x6e   :  { %v3350_v38 = vld [vmem:[#allocation2 + $0x5cc] ss:$20 sps:$4 sm:$0xff]  }
  0x70   :  { %1713 = vmatpush1.bf16.msra.mxu0 %v3264_v39  ;;  %1885 = vmatpush1.bf16.msra.mxu1 %v3267_v40  ;;  %v3353_v39 = vld [vmem:[#allocation2 + $0x5d4] ss:$20 sps:$4 sm:$0xff]  }
  0x71   :  { %1714 = vmatprep.subr.bf16.mxu0 %v3272_v41  ;;  %1886 = vmatprep.subr.bf16.mxu1 %v3275_v42  ;;  %v3348_v40 = vld [vmem:[#allocation2 + $0x5c8] ss:$20 sps:$4 sm:$0xff]   ;;  %v3351_v41 = vld [vmem:[#allocation2 + $0x5d0] ss:$20 sps:$4 sm:$0xff]  }
  0x72   :  { %v3356_v42 = vld [vmem:[#allocation2 + $0x5f4] ss:$20 sps:$4 sm:$0xff]  }
  0x74   :  { %1715 = vmatpush1.bf16.msra.mxu0 %v3270_v43  ;;  %1887 = vmatpush1.bf16.msra.mxu1 %v3273_v44  ;;  %v3359_v43 = vld [vmem:[#allocation2 + $0x5fc] ss:$20 sps:$4 sm:$0xff]  }
  0x75   :  { %1716 = vmatprep.subr.bf16.mxu0 %v3278_v45  ;;  %1888 = vmatprep.subr.bf16.mxu1 %v3281_v46  ;;  %v3354_v44 = vld [vmem:[#allocation2 + $0x5f0] ss:$20 sps:$4 sm:$0xff]   ;;  %v3357_v45 = vld [vmem:[#allocation2 + $0x5f8] ss:$20 sps:$4 sm:$0xff]  }
  0x76   :  { %v3362_v46 = vld [vmem:[#allocation2 + $0x61c] ss:$20 sps:$4 sm:$0xff]  }
  0x78   :  { %1717 = vmatpush1.bf16.msra.mxu0 %v3276_v47  ;;  %1889 = vmatpush1.bf16.msra.mxu1 %v3279_v48  ;;  %v3365_v47 = vld [vmem:[#allocation2 + $0x624] ss:$20 sps:$4 sm:$0xff]  }
  0x79   :  { %1718 = vmatprep.subr.bf16.mxu0 %v3284_v49  ;;  %1890 = vmatprep.subr.bf16.mxu1 %v3287_v51  ;;  %v3360_v48 = vld [vmem:[#allocation2 + $0x618] ss:$20 sps:$4 sm:$0xff]   ;;  %v3363_v49 = vld [vmem:[#allocation2 + $0x620] ss:$20 sps:$4 sm:$0xff]  }
  0x7a   :  { %v3368_v51 = vld [vmem:[#allocation2 + $0x644] ss:$20 sps:$4 sm:$0xff]  }
  0x7c   :  { %1719 = vmatpush1.bf16.msra.mxu0 %v3282_v52  ;;  %1891 = vmatpush1.bf16.msra.mxu1 %v3285_v53  ;;  %v3371_v52 = vld [vmem:[#allocation2 + $0x64c] ss:$20 sps:$4 sm:$0xff]  }
  0x7d   :  { %1720 = vmatprep.subr.bf16.mxu0 %v3290_v54  ;;  %1892 = vmatprep.subr.bf16.mxu1 %v3293_v55  ;;  %v3366_v53 = vld [vmem:[#allocation2 + $0x640] ss:$20 sps:$4 sm:$0xff]   ;;  %v3369_v54 = vld [vmem:[#allocation2 + $0x648] ss:$20 sps:$4 sm:$0xff]  }
  0x7e   :  { %v3374_v55 = vld [vmem:[#allocation2 + $0x66c] ss:$20 sps:$4 sm:$0xff]  }
  0x80   :  { %1721 = vmatpush1.bf16.msra.mxu0 %v3288_v56  ;;  %1893 = vmatpush1.bf16.msra.mxu1 %v3291_v57  ;;  %v3377_v56 = vld [vmem:[#allocation2 + $0x674] ss:$20 sps:$4 sm:$0xff]  }
  0x81   :  { %1722 = vmatprep.subr.bf16.mxu0 %v3296_v58  ;;  %1894 = vmatprep.subr.bf16.mxu1 %v3299_v59  ;;  %v3372_v57 = vld [vmem:[#allocation2 + $0x668] ss:$20 sps:$4 sm:$0xff]   ;;  %v3375_v58 = vld [vmem:[#allocation2 + $0x670] ss:$20 sps:$4 sm:$0xff]  }
  0x82   :  { %v3380_v59 = vld [vmem:[#allocation2 + $0x694] ss:$20 sps:$4 sm:$0xff]  }
  0x84   :  { %1723 = vmatpush1.bf16.msra.mxu0 %v3294_v60  ;;  %1895 = vmatpush1.bf16.msra.mxu1 %v3297_v61  ;;  %v3383_v60 = vld [vmem:[#allocation2 + $0x69c] ss:$20 sps:$4 sm:$0xff]  }
  0x85   :  { %1724 = vmatprep.subr.bf16.mxu0 %v3302_v62  ;;  %1896 = vmatprep.subr.bf16.mxu1 %v3305_v63  ;;  %v3378_v61 = vld [vmem:[#allocation2 + $0x690] ss:$20 sps:$4 sm:$0xff]   ;;  %v3381_v62 = vld [vmem:[#allocation2 + $0x698] ss:$20 sps:$4 sm:$0xff]  }
  0x86   :  { %v3386_v63 = vld [vmem:[#allocation2 + $0x6bc] ss:$20 sps:$4 sm:$0xff]  }
  0x88   :  { %1725 = vmatpush1.bf16.msra.mxu0 %v3300_v0  ;;  %1897 = vmatpush1.bf16.msra.mxu1 %v3303_v1  ;;  %v3389_v0 = vld [vmem:[#allocation2 + $0x6c4] ss:$20 sps:$4 sm:$0xff]  }
  0x89   :  { %1726 = vmatprep.subr.bf16.mxu0 %v3308_v2  ;;  %1898 = vmatprep.subr.bf16.mxu1 %v3311_v3  ;;  %v3384_v1 = vld [vmem:[#allocation2 + $0x6b8] ss:$20 sps:$4 sm:$0xff]   ;;  %v3387_v2 = vld [vmem:[#allocation2 + $0x6c0] ss:$20 sps:$4 sm:$0xff]  }
  0x8a   :  { %v3392_v3 = vld [vmem:[#allocation2 + $0x6e4] ss:$20 sps:$4 sm:$0xff]  }
  0x8c   :  { %1727 = vmatpush1.bf16.msra.mxu0 %v3306_v4  ;;  %1899 = vmatpush1.bf16.msra.mxu1 %v3309_v5  ;;  %v3395_v4 = vld [vmem:[#allocation2 + $0x6ec] ss:$20 sps:$4 sm:$0xff]  }
  0x8d   :  { %1728 = vmatprep.subr.bf16.mxu0 %v3314_v6  ;;  %1900 = vmatprep.subr.bf16.mxu1 %v3317_v7  ;;  %v3390_v5 = vld [vmem:[#allocation2 + $0x6e0] ss:$20 sps:$4 sm:$0xff]   ;;  %v3393_v6 = vld [vmem:[#allocation2 + $0x6e8] ss:$20 sps:$4 sm:$0xff]  }
  0x8e   :  { %v3398_v7 = vld [vmem:[#allocation2 + $0x70c] ss:$20 sps:$4 sm:$0xff]  }
  0x90   :  { %1729 = vmatpush1.bf16.msra.mxu0 %v3312_v8  ;;  %1901 = vmatpush1.bf16.msra.mxu1 %v3315_v10  ;;  %v3401_v8 = vld [vmem:[#allocation2 + $0x714] ss:$20 sps:$4 sm:$0xff]  }
  0x91   :  { %1741 = vmatprep.subr.bf16.mxu0 %v3320_v11  ;;  %1913 = vmatprep.subr.bf16.mxu1 %v3323_v14  ;;  %v3396_v10 = vld [vmem:[#allocation2 + $0x708] ss:$20 sps:$4 sm:$0xff]   ;;  %v3399_v11 = vld [vmem:[#allocation2 + $0x710] ss:$20 sps:$4 sm:$0xff]  }
  0x92   :  { %v3402_v14 = vld [vmem:[#allocation2 + $0x730] ss:$20 sps:$4 sm:$0xff]  }
  0x93   :  { %1731 = vmatmul.mubr.bf16.vlgmr.msra.gmra.mrb[0].mxu0 %v3617_v17  ;;  %1903 = vmatmul.mubr.bf16.vlgmr.msra.gmra.mrb[0].mxu1 %v3617_v17 }
  0x94   :  { %1742 = vmatpush1.bf16.msra.mxu0 %v3318_v15  ;;  %1914 = vmatpush1.bf16.msra.mxu1 %v3321_v16  ;;  %v3405_v15 = vld [vmem:[#allocation2 + $0x738] ss:$20 sps:$4 sm:$0xff]   ;;  %v3410_v16 = vld [vmem:[#allocation2 + $0x75c] ss:$20 sps:$4 sm:$0xff]  }
  0x95   :  { %1743 = vmatprep.subr.bf16.mxu0 %v3326_v18  ;;  %1915 = vmatprep.subr.bf16.mxu1 %v3329_v19  ;;  %v3413_v18 = vld [vmem:[#allocation2 + $0x764] ss:$20 sps:$4 sm:$0xff]  }
  0x96   :  { %1773 = vmatprep.mubr.bf16.mxu0 %v3627_v25  ;;  %1945 = vmatprep.mubr.bf16.mxu1 %v3627_v25  ;;  %v3408_v19 = vld [vmem:[#allocation2 + $0x758] ss:$20 sps:$4 sm:$0xff]  }
  0x98   :  { %1744 = vmatpush1.bf16.msra.mxu0 %v3324_v21  ;;  %1916 = vmatpush1.bf16.msra.mxu1 %v3327_v22  ;;  %v39_v21 = vld [vmem:[%s3803_s0 + $0x20] sm:$0xff]  ;;  %v46_v22 = vld [vmem:[%s3803_s0 + $0x58] sm:$0xff] }
  0x99   :  { %1745 = vmatprep.subr.bf16.mxu0 %v3332_v24  ;;  %1917 = vmatprep.subr.bf16.mxu1 %v3335_v26  ;;  %v3419_v24 = vld [vmem:[#allocation2 + $0x78c] ss:$20 sps:$4 sm:$0xff]   ;;  %v3637_v26 = vpack.c.bf16 %v46_v22, %v39_v21  ;;  %v3483_v21 = vld [vmem:[%s3806_s3 + $0x18] sm:$0xff]  }
  0x9a   :  { %v3464_v22 = vld [vmem:[#allocation2 + $0x740] ss:$20 sps:$4 sm:$0xff]  }
  0x9c   :  { %1746 = vmatpush1.bf16.msra.mxu0 %v3330_v27  ;;  %1918 = vmatpush1.bf16.msra.mxu1 %v3333_v28  ;;  %v3414_v27 = vld [vmem:[#allocation2 + $0x780] ss:$20 sps:$4 sm:$0xff]   ;;  %v3417_v28 = vld [vmem:[#allocation2 + $0x788] ss:$20 sps:$4 sm:$0xff]  }
  0x9d   :  { %1747 = vmatprep.subr.bf16.mxu0 %v3338_v29  ;;  %1919 = vmatprep.subr.bf16.mxu1 %v3341_v30  ;;  %v3420_v29 = vld [vmem:[#allocation2 + $0x150] ss:$20 sps:$4 sm:$0xff]  }
  0x9e   :  { %v3422_v30 = vld [vmem:[#allocation2 + $0x3d0] ss:$20 sps:$4 sm:$0xff]  }
  0xa0   :  { %1748 = vmatpush1.bf16.msra.mxu0 %v3336_v31  ;;  %1920 = vmatpush1.bf16.msra.mxu1 %v3339_v32  ;;  %v3536_v31 = vmov 0   ;;  %v41_v32 = vld [vmem:[%s3803_s0 + $0x30] sm:$0xff] }
  0xa1   :  { %1749 = vmatprep.subr.bf16.mxu0 %v3344_v33  ;;  %1921 = vmatprep.subr.bf16.mxu1 %v3347_v34  ;;  %v48_v33 = vld [vmem:[%s3803_s0 + $0x68] sm:$0xff]  ;;  %v3421_v34 = vld [vmem:[#allocation2 + $0x10] ss:$20 sps:$4 sm:$0xff]  }
  0xa4   :  { %1750 = vmatpush1.bf16.msra.mxu0 %v3342_v35  ;;  %1922 = vmatpush1.bf16.msra.mxu1 %v3345_v37  ;;  %v3647_v35 = vpack.c.bf16 %v48_v33, %v41_v32  ;;  %v3423_v37 = vld [vmem:[#allocation2 + $0x290] ss:$20 sps:$4 sm:$0xff]   ;;  %v3474_v33 = vld [vmem:[%s3806_s3 + $0xc8] sm:$0xff]  }
  0xa5   :  { %1751 = vmatprep.subr.bf16.mxu0 %v3350_v38  ;;  %1923 = vmatprep.subr.bf16.mxu1 %v3353_v39  ;;  %v3424_v38 = vld [vmem:[#allocation2 + $0x178] ss:$20 sps:$4 sm:$0xff]   ;;  %v3472_v32 = vld [vmem:[%s3806_s3 + $0x80] sm:$0xff]  }
  0xa6   :  { %v3426_v39 = vld [vmem:[#allocation2 + $0x3f8] ss:$20 sps:$4 sm:$0xff]  }
  0xa8   :  { %1752 = vmatpush1.bf16.msra.mxu0 %v3348_v40  ;;  %1924 = vmatpush1.bf16.msra.mxu1 %v3351_v41  ;;  %v3425_v40 = vld [vmem:[#allocation2 + $0x38] ss:$20 sps:$4 sm:$0xff]  }
  0xa9   :  { %1753 = vmatprep.subr.bf16.mxu0 %v3356_v42  ;;  %1925 = vmatprep.subr.bf16.mxu1 %v3359_v43  ;;  %v3427_v41 = vld [vmem:[#allocation2 + $0x2b8] ss:$20 sps:$4 sm:$0xff]   ;;  %v3428_v42 = vld [vmem:[#allocation2 + $0x1a0] ss:$20 sps:$4 sm:$0xff]  }
  0xaa   :  { %v3430_v43 = vld [vmem:[#allocation2 + $0x420] ss:$20 sps:$4 sm:$0xff]  }
  0xac   :  { %1754 = vmatpush1.bf16.msra.mxu0 %v3354_v44  ;;  %1926 = vmatpush1.bf16.msra.mxu1 %v3357_v45  ;;  %v3429_v44 = vld [vmem:[#allocation2 + $0x60] ss:$20 sps:$4 sm:$0xff]  }
  0xad   :  { %1755 = vmatprep.subr.bf16.mxu0 %v3362_v46  ;;  %1927 = vmatprep.subr.bf16.mxu1 %v3365_v47  ;;  %v3431_v45 = vld [vmem:[#allocation2 + $0x2e0] ss:$20 sps:$4 sm:$0xff]   ;;  %v3432_v46 = vld [vmem:[#allocation2 + $0x1c8] ss:$20 sps:$4 sm:$0xff]  }
  0xae   :  { %v3434_v47 = vld [vmem:[#allocation2 + $0x448] ss:$20 sps:$4 sm:$0xff]  }
  0xb0   :  { %1756 = vmatpush1.bf16.msra.mxu0 %v3360_v48  ;;  %1928 = vmatpush1.bf16.msra.mxu1 %v3363_v49  ;;  %v3433_v48 = vld [vmem:[#allocation2 + $0x88] ss:$20 sps:$4 sm:$0xff]  }
  0xb1   :  { %1757 = vmatprep.subr.bf16.mxu0 %v3368_v51  ;;  %1929 = vmatprep.subr.bf16.mxu1 %v3371_v52  ;;  %v3435_v49 = vld [vmem:[#allocation2 + $0x308] ss:$20 sps:$4 sm:$0xff]   ;;  %v3436_v51 = vld [vmem:[#allocation2 + $0x1f0] ss:$20 sps:$4 sm:$0xff]  }
  0xb2   :  { %v3438_v52 = vld [vmem:[#allocation2 + $0x470] ss:$20 sps:$4 sm:$0xff]  }
  0xb4   :  { %1758 = vmatpush1.bf16.msra.mxu0 %v3366_v53  ;;  %1930 = vmatpush1.bf16.msra.mxu1 %v3369_v54  ;;  %v3437_v53 = vld [vmem:[#allocation2 + $0xb0] ss:$20 sps:$4 sm:$0xff]   ;;  %v3442_v54 = vld [vmem:[#allocation2 + $0x498] ss:$20 sps:$4 sm:$0xff]  }
  0xb5   :  { %1759 = vmatprep.subr.bf16.mxu0 %v3374_v55  ;;  %1931 = vmatprep.subr.bf16.mxu1 %v3377_v56  ;;  %v3441_v55 = vld [vmem:[#allocation2 + $0xd8] ss:$20 sps:$4 sm:$0xff]  }
  0xb6   :  { %v3443_v56 = vld [vmem:[#allocation2 + $0x358] ss:$20 sps:$4 sm:$0xff]  }
  0xb8   :  { %1760 = vmatpush1.bf16.msra.mxu0 %v3372_v57  ;;  %1932 = vmatpush1.bf16.msra.mxu1 %v3375_v58  ;;  %v3444_v57 = vld [vmem:[#allocation2 + $0x240] ss:$20 sps:$4 sm:$0xff]  }
  0xb9   :  { %1761 = vmatprep.subr.bf16.mxu0 %v3380_v59  ;;  %1933 = vmatprep.subr.bf16.mxu1 %v3383_v60  ;;  %v3446_v58 = vld [vmem:[#allocation2 + $0x4c0] ss:$20 sps:$4 sm:$0xff]  }
  0xba   :  { %v3445_v59 = vld [vmem:[#allocation2 + $0x100] ss:$20 sps:$4 sm:$0xff]  }
  0xbb   :  { %v3447_v60 = vld [vmem:[#allocation2 + $0x380] ss:$20 sps:$4 sm:$0xff]  }
  0xbc   :  { %1762 = vmatpush1.bf16.msra.mxu0 %v3378_v61  ;;  %1934 = vmatpush1.bf16.msra.mxu1 %v3381_v62  ;;  %v3448_v61 = vld [vmem:[#allocation2 + $0x268] ss:$20 sps:$4 sm:$0xff]  }
  0xbd   :  { %1763 = vmatprep.subr.bf16.mxu0 %v3386_v63  ;;  %1935 = vmatprep.subr.bf16.mxu1 %v3389_v0  ;;  %v3450_v62 = vld [vmem:[#allocation2 + $0x4e8] ss:$20 sps:$4 sm:$0xff]  }
  0xbe   :  { %v3449_v63 = vld [vmem:[#allocation2 + $0x128] ss:$20 sps:$4 sm:$0xff]  }
  0xbf   :  { %v3451_v0 = vld [vmem:[#allocation2 + $0x3a8] ss:$20 sps:$4 sm:$0xff]  }
  0xc0   :  { %1764 = vmatpush1.bf16.msra.mxu0 %v3384_v1  ;;  %1936 = vmatpush1.bf16.msra.mxu1 %v3387_v2  ;;  %v3452_v1 = vld [vmem:[#allocation2 + $0x650] ss:$20 sps:$4 sm:$0xff]  }
  0xc1   :  { %1765 = vmatprep.subr.bf16.mxu0 %v3392_v3  ;;  %1937 = vmatprep.subr.bf16.mxu1 %v3395_v4  ;;  %v3453_v2 = vld [vmem:[#allocation2 + $0x510] ss:$20 sps:$4 sm:$0xff]   ;;  %v3454_v4 = vld [vmem:[#allocation2 + $0x678] ss:$20 sps:$4 sm:$0xff]  }
  0xc2   :  { %v3468_v3 = vld [vmem:[#allocation2 + $0x790] ss:$20 sps:$4 sm:$0xff]  }
  0xc4   :  { %1766 = vmatpush1.bf16.msra.mxu0 %v3390_v5  ;;  %1938 = vmatpush1.bf16.msra.mxu1 %v3393_v6  ;;  %v3537_v5 = vmov 0.0   ;;  %v3469_v6 = vld [vmem:[%s3806_s3 + $0x40] sm:$0xff]  }
  0xc5   :  { %1767 = vmatprep.subr.bf16.mxu0 %v3398_v7  ;;  %1939 = vmatprep.subr.bf16.mxu1 %v3401_v8  ;;  %v3455_v7 = vld [vmem:[#allocation2 + $0x538] ss:$20 sps:$4 sm:$0xff]   ;;  %v3456_v8 = vld [vmem:[#allocation2 + $0x6a0] ss:$20 sps:$4 sm:$0xff]  }
  0xc8   :  { %1768 = vmatpush1.bf16.msra.mxu0 %v3396_v10  ;;  %1940 = vmatpush1.bf16.msra.mxu1 %v3399_v11  ;;  %v3457_v10 = vld [vmem:[#allocation2 + $0x560] ss:$20 sps:$4 sm:$0xff]   ;;  %v3473_v11 = vld [vmem:[%s3806_s3 + $0x48] sm:$0xff]  }
  0xc9   :  { %1769 = vmatprep.subr.bf16.mxu0 %v3404_v12  ;;  %1941 = vmatprep.subr.bf16.mxu1 %v3407_v13  ;;  %v3475_v12 = vld [vmem:[%s3806_s3 + $0x8] sm:$0xff]   ;;  %v3460_v13 = vld [vmem:[#allocation2 + $0x6f0] ss:$20 sps:$4 sm:$0xff]  }
  0xcc   :  { %1770 = vmatpush1.bf16.msra.mxu0 %v3402_v14  ;;  %1942 = vmatpush1.bf16.msra.mxu1 %v3405_v15  ;;  %v3477_v14 = vld [vmem:[%s3806_s3 + $0x50] sm:$0xff]  }
  0xcd   :  { %1771 = vmatprep.subr.bf16.mxu0 %v3410_v16  ;;  %1943 = vmatprep.subr.bf16.mxu1 %v3413_v18  ;;  %v3461_v15 = vld [vmem:[#allocation2 + $0x5b0] ss:$20 sps:$4 sm:$0xff]   ;;  %v3462_v18 = vld [vmem:[#allocation2 + $0x718] ss:$20 sps:$4 sm:$0xff]  }
  0xce   :  { %v3479_v16 = vld [vmem:[%s3806_s3 + $0x10] sm:$0xff]  }
  0xd0   :  { %1772 = vmatpush1.bf16.msra.mxu0 %v3408_v19  ;;  %1944 = vmatpush1.bf16.msra.mxu1 %v3411_v20  ;;  %v3481_v19 = vld [vmem:[%s3806_s3 + $0x58] sm:$0xff]  }
  0xd1   :  { %1784 = vmatprep.subr.bf16.mxu0 %v3416_v23  ;;  %1956 = vmatprep.subr.bf16.mxu1 %v3419_v24  ;;  %v3463_v20 = vld [vmem:[#allocation2 + $0x5d8] ss:$20 sps:$4 sm:$0xff]   ;;  %v3485_v23 = vld [vmem:[%s3806_s3 + $0x60] sm:$0xff]  }
  0xd2   :  { %v3465_v24 = vld [vmem:[#allocation2 + $0x600] ss:$20 sps:$4 sm:$0xff]  }
  0xd3   :  { %1774 = vmatmul.mubr.bf16.vlgmr.msra.gmra.mrb[0].mxu0 %v3637_v26  ;;  %1946 = vmatmul.mubr.bf16.vlgmr.msra.gmra.mrb[0].mxu1 %v3637_v26 }
  0xd4   :  { %1785 = vmatpush1.bf16.msra.mxu0 %v3414_v27  ;;  %1957 = vmatpush1.bf16.msra.mxu1 %v3417_v28  ;;  %v3487_v27 = vld [vmem:[%s3806_s3 + $0x20] sm:$0xff]   ;;  %v3466_v28 = vld [vmem:[#allocation2 + $0x768] ss:$20 sps:$4 sm:$0xff]  }
  0xd5   :  { %1816 = vmatprep.mubr.bf16.mxu0 %v3536_v31  ;;  %1988 = vmatprep.mubr.bf16.mxu1 %v3536_v31  ;;  %v3470_v31 = vld [vmem:[%s3806_s3 + $0xc0] sm:$0xff]  }
  0xd6   :  { %2941 = vmatprep.subr.bf16.mxu0 %v3420_v29  ;;  %2963 = vmatprep.subr.bf16.mxu1 %v3422_v30  ;;  %v3489_v29 = vld [vmem:[%s3806_s3 + $0x68] sm:$0xff]  }
  0xd7   :  { %v3467_v30 = vld [vmem:[#allocation2 + $0x628] ss:$20 sps:$4 sm:$0xff]  }
  0xdf   :  { %2888 = vmatmul.mubr.msk.bf16.vlgmr.msra.gmra.mrb[0].mxu0 %vm1651_vm0, %v3647_v35  ;;  %2889 = vmatmul.mubr.msk.bf16.vlgmr.msra.gmra.mrb[0].mxu1 %vm1651_vm0, %v3647_v35 }
  0xe0   :  { %2942 = vmatpush3.bf16.msra.mxu0 %v3421_v34  ;;  %2964 = vmatpush3.bf16.msra.mxu1 %v3423_v37  ;;  %v3476_v34 = vld [vmem:[%s3806_s3 + $0x88] sm:$0xff]   ;;  %v3480_v37 = vld [vmem:[%s3806_s3 + $0x90] sm:$0xff]  }
  0xe1   :  { %2943 = vmatprep.subr.bf16.mxu0 %v3424_v38  ;;  %2965 = vmatprep.subr.bf16.mxu1 %v3426_v39  ;;  %v3484_v38 = vld [vmem:[%s3806_s3 + $0x98] sm:$0xff]   ;;  %v3486_v39 = vld [vmem:[%s3806_s3 + $0xe0] sm:$0xff]  }
  0xe2   :  { %2031 = vmatprep.mubr.bf16.mxu0 %v3587_v50  ;;  %2072 = vmatprep.mubr.bf16.mxu1 %v3607_v36  ;;  %v3439_v50 = vld [vmem:[#allocation2 + $0x330] ss:$20 sps:$4 sm:$0xff]   ;;  %v3440_v36 = vld [vmem:[#allocation2 + $0x218] ss:$20 sps:$4 sm:$0xff]  }
  0xe4   :  { %2944 = vmatpush3.bf16.msra.mxu0 %v3425_v40  ;;  %2966 = vmatpush3.bf16.msra.mxu1 %v3427_v41  ;;  %v3488_v40 = vld [vmem:[%s3806_s3 + $0xa0] sm:$0xff]   ;;  %v3490_v41 = vld [vmem:[%s3806_s3 + $0xe8] sm:$0xff]  }
  0xe5   :  { %2945 = vmatprep.subr.bf16.mxu0 %v3428_v42  ;;  %2967 = vmatprep.subr.bf16.mxu1 %v3430_v43  ;;  %v3491_v42 = vld [vmem:[%s3806_s3 + $0x28] sm:$0xff]  }
  0xe6   :  { %v3492_v43 = vld [vmem:[%s3806_s3 + $0xa8] sm:$0xff]  }
  0xe8   :  { %2946 = vmatpush3.bf16.msra.mxu0 %v3429_v44  ;;  %2968 = vmatpush3.bf16.msra.mxu1 %v3431_v45  ;;  %v3493_v44 = vld [vmem:[%s3806_s3 + $0x70] sm:$0xff]  }
  0xe9   :  { %2947 = vmatprep.subr.bf16.mxu0 %v3432_v46  ;;  %2969 = vmatprep.subr.bf16.mxu1 %v3434_v47  ;;  %v3494_v45 = vld [vmem:[%s3806_s3 + $0xf0] sm:$0xff]  }
  0xea   :  { %v3495_v46 = vld [vmem:[%s3806_s3 + $0x30] sm:$0xff]  }
  0xeb   :  { %v3496_v47 = vld [vmem:[%s3806_s3 + $0xb0] sm:$0xff]  }
  0xec   :  { %2948 = vmatpush3.bf16.msra.mxu0 %v3433_v48  ;;  %2970 = vmatpush3.bf16.msra.mxu1 %v3435_v49  ;;  %v3497_v48 = vld [vmem:[%s3806_s3 + $0x78] sm:$0xff]  }
  0xed   :  { %2949 = vmatprep.subr.bf16.mxu0 %v3436_v51  ;;  %2971 = vmatprep.subr.bf16.mxu1 %v3438_v52  ;;  %v3498_v49 = vld [vmem:[%s3806_s3 + $0xf8] sm:$0xff]  }
  0xee   :  { %v3499_v51 = vld [vmem:[%s3806_s3 + $0x38] sm:$0xff]  }
  0xef   :  { %v3500_v52 = vld [vmem:[%s3806_s3 + $0xb8] sm:$0xff]  }
  0xf0   :  { %2950 = vmatpush3.bf16.msra.mxu0 %v3437_v53  ;;  %2972 = vmatpush3.bf16.msra.mxu1 %v3439_v50  ;;  %v352_v53 = vlaneseq }
  0xf1   :  { %2951 = vmatprep.subr.bf16.mxu0 %v3440_v36  ;;  %2973 = vmatprep.subr.bf16.mxu1 %v3442_v54 }
  0xf2   :  { %v353_v50 = vshrl.u32 %v352_v53, 7 }
  0xf4   :  { %2952 = vmatpush3.bf16.msra.mxu0 %v3441_v55  ;;  %2974 = vmatpush3.bf16.msra.mxu1 %v3443_v56  ;;  %v354_v36 = vsub.s32 0, %v353_v50  ;;  %v362_v54 = vsub.s32 2, %v353_v50  ;;  %v350_v55 = vld [vmem:[%s3805_s2] sm:$0x1f]  ;;  %v358_v56 = vsub.s32 1, %v353_v50 }
  0xf5   :  { %2953 = vmatprep.subr.bf16.mxu0 %v3444_v57  ;;  %2975 = vmatprep.subr.bf16.mxu1 %v3446_v58  ;;  %v366_v57 = vsub.s32 3, %v353_v50 }
  0xf6   :  { %v355_v58 = vrot.slane %v350_v55, %v354_v36 }
  0xf8   :  { %2954 = vmatpush3.bf16.msra.mxu0 %v3445_v59  ;;  %2976 = vmatpush3.bf16.msra.mxu1 %v3447_v60  ;;  %v363_v59 = vrot.slane %v350_v55, %v362_v54  ;;  %v359_v60 = vrot.slane %v350_v55, %v358_v56 }
  0xf9   :  { %2955 = vmatprep.subr.bf16.mxu0 %v3448_v61  ;;  %2977 = vmatprep.subr.bf16.mxu1 %v3450_v62  ;;  %v367_v61 = vrot.slane %v350_v55, %v366_v57 }
  0xfc   :  { %2956 = vmatpush3.bf16.msra.mxu0 %v3449_v63  ;;  %2978 = vmatpush3.bf16.msra.mxu1 %v3451_v0 }
  0xfd   :  { %2985 = vmatprep.subr.bf16.mxu0 %v3452_v1  ;;  %3062 = vmatprep.subr.bf16.mxu1 %v3537_v5 }
  0xff   :  { %2032 = vmatmul.mubr.bf16.vlgmr.msra.gmra.mrb[4].mxu0 %v3597_v9  ;;  %2073 = vmatmul.mubr.bf16.vlgmr.msra.gmra.mrb[4].mxu1 %v3617_v17  ;;  %v3471_v9 = vld [vmem:[%s3806_s3] sm:$0xff]   ;;  %v3458_v17 = vld [vmem:[#allocation2 + $0x6c8] ss:$20 sps:$4 sm:$0xff]  }
 0x100   :  { %2986 = vmatpush3.bf16.msra.mxu0 %v3453_v2  ;;  %3063 = vmatpush3.bf16.msra.mxu1 %v3468_v3 }
 0x101   :  { %2987 = vmatprep.subr.bf16.mxu0 %v3454_v4  ;;  %2113 = vmatprep.mubr.bf16.mxu0 %v3627_v25  ;;  %v3459_v25 = vld [vmem:[#allocation2 + $0x588] ss:$20 sps:$4 sm:$0xff]  }
 0x102   :  { %3064 = vmatprep.mubr.msk.bf16.mxu1 %vm3538_vm1, %v3537_v5  ;;  %3009 = vmatprep.subr.bf16.mxu1 %v3469_v6 }
 0x104   :  { %2988 = vmatpush3.bf16.msra.mxu0 %v3455_v7 }
 0x105   :  { %2989 = vmatprep.subr.bf16.mxu0 %v3456_v8 }
 0x107   :  { %3065 = vmatmul.mubr.msk.bf16.vlgmr.msra.gmra.mrb[8].mxu1 %vm1651_vm0, %v3647_v35  ;;  %v3478_v35 = vld [vmem:[%s3806_s3 + $0xd0] sm:$0xff]  }
 0x108   :  { %2990 = vmatpush3.bf16.msra.mxu0 %v3457_v10  ;;  %3010 = vmatpush3.bf16.msra.mxu1 %v3471_v9 }
 0x109   :  { %2991 = vmatprep.subr.bf16.mxu0 %v3458_v17  ;;  %3011 = vmatprep.subr.bf16.mxu1 %v3473_v11 }
 0x10c   :  { %2992 = vmatpush3.bf16.msra.mxu0 %v3459_v25  ;;  %3012 = vmatpush3.bf16.msra.mxu1 %v3475_v12 }
 0x10d   :  { %2993 = vmatprep.subr.bf16.mxu0 %v3460_v13  ;;  %3013 = vmatprep.subr.bf16.mxu1 %v3477_v14 }
 0x110   :  { %2994 = vmatpush3.bf16.msra.mxu0 %v3461_v15  ;;  %3014 = vmatpush3.bf16.msra.mxu1 %v3479_v16 }
 0x111   :  { %2995 = vmatprep.subr.bf16.mxu0 %v3462_v18  ;;  %3015 = vmatprep.subr.bf16.mxu1 %v3481_v19 }
 0x114   :  { %2996 = vmatpush3.bf16.msra.mxu0 %v3463_v20  ;;  %3016 = vmatpush3.bf16.msra.mxu1 %v3483_v21 }
 0x115   :  { %2997 = vmatprep.subr.bf16.mxu0 %v3464_v22  ;;  %3017 = vmatprep.subr.bf16.mxu1 %v3485_v23 }
 0x118   :  { %2998 = vmatpush3.bf16.msra.mxu0 %v3465_v24  ;;  %3018 = vmatpush3.bf16.msra.mxu1 %v3487_v27 }
 0x119   :  { %2999 = vmatprep.subr.bf16.mxu0 %v3466_v28  ;;  %3019 = vmatprep.subr.bf16.mxu1 %v3489_v29  ;;  %v3501_v28 = vld [vmem:[%s3806_s3 + $0x100] sm:$0xff]   ;;  %v3502_v29 = vld [vmem:[%s3806_s3 + $0x108] sm:$0xff]  }
 0x11c   :  { %3000 = vmatpush3.bf16.msra.mxu0 %v3467_v30  ;;  %3020 = vmatpush3.bf16.msra.mxu1 %v3491_v42  ;;  %v3503_v30 = vld [vmem:[%s3806_s3 + $0x110] sm:$0xff]  }
 0x11d   :  { %3031 = vmatprep.subr.bf16.mxu0 %v3470_v31  ;;  %3021 = vmatprep.subr.bf16.mxu1 %v3493_v44  ;;  %v3504_v31 = vld [vmem:[%s3806_s3 + $0x118] sm:$0xff]  }
 0x11f   :  { %2114 = vmatmul.mubr.bf16.vlgmr.msra.gmra.mrb[8].mxu0 %v3637_v26  ;;  %v3482_v26 = vld [vmem:[%s3806_s3 + $0xd8] sm:$0xff]  }
 0x120   :  { %3032 = vmatpush3.bf16.msra.mxu0 %v3472_v32  ;;  %3022 = vmatpush3.bf16.msra.mxu1 %v3495_v46  ;;  %v3505_v32 = vld [vmem:[%s3806_s3 + $0x120] sm:$0xff]  }
 0x121   :  { %3033 = vmatprep.subr.bf16.mxu0 %v3474_v33  ;;  %3023 = vmatprep.subr.bf16.mxu1 %v3497_v48  ;;  %v370_v33 = vsub.s32 4, %v353_v50 }
 0x124   :  { %3034 = vmatpush3.bf16.msra.mxu0 %v3476_v34  ;;  %3024 = vmatpush3.bf16.msra.mxu1 %v3499_v51  ;;  %v3506_v34 = vld [vmem:[%s3806_s3 + $0x128] sm:$0xff]   ;;  %v3508_v51 = vld [vmem:[%s3806_s3 + $0x138] sm:$0xff]  }
 0x125   :  { %3035 = vmatprep.subr.bf16.mxu0 %v3478_v35  ;;  %3068 = vmatprep.subr.bf16.mxu1 %v3537_v5 }
 0x128   :  { %3036 = vmatpush3.bf16.msra.mxu0 %v3480_v37  ;;  %v371_v37 = vrot.slane %v350_v55, %v370_v33 }
 0x129   :  { %3037 = vmatprep.subr.bf16.mxu0 %v3482_v26 }
 0x12c   :  { %3038 = vmatpush3.bf16.msra.mxu0 %v3484_v38  ;;  %v3507_v38 = vld [vmem:[%s3806_s3 + $0x130] sm:$0xff]  }
 0x12d   :  { %3039 = vmatprep.subr.bf16.mxu0 %v3486_v39 }
 0x130   :  { %3040 = vmatpush3.bf16.msra.mxu0 %v3488_v40 }
 0x131   :  { %3041 = vmatprep.subr.bf16.mxu0 %v3490_v41 }
 0x134   :  { %3042 = vmatpush3.bf16.msra.mxu0 %v3492_v43 }
 0x135   :  { %3043 = vmatprep.subr.bf16.mxu0 %v3494_v45 }
 0x138   :  { %3044 = vmatpush3.bf16.msra.mxu0 %v3496_v47 }
 0x139   :  { %3045 = vmatprep.subr.bf16.mxu0 %v3498_v49 }
 0x13c   :  { %3046 = vmatpush3.bf16.msra.mxu0 %v3500_v52 }
 0x1b2   :  { %v1818_v62 = vpop.f32.mrb[0].mxu0  ;;  %v1990_v63 = vpop.f32.mrb[0].mxu1 }
 0x1b3   :  { %v3088_v0 = vadd.f32 %v1818_v62, %v355_v58  ;;  %v3092_v1 = vadd.f32 %v1990_v63, %v363_v59  ;;  %v1820_v2 = vpop.f32.mrb[1].mxu0  ;;  %v1992_v3 = vpop.f32.mrb[1].mxu1 }
 0x1b4   :  { %v3089_v4 = vadd.f32 %v1820_v2, %v359_v60  ;;  %v3093_v6 = vadd.f32 %v1992_v3, %v367_v61  ;;  %v1822_v7 = vpop.f32.mrb[2].mxu0  ;;  %v1994_v8 = vpop.f32.mrb[2].mxu1 }
 0x1b5   :  { %v3090_v10 = vadd.f32 %v1822_v7, %v355_v58  ;;  %v3094_v9 = vadd.f32 %v1994_v8, %v363_v59  ;;  %v1824_v17 = vpop.f32.mrb[3].mxu0  ;;  %v1996_v11 = vpop.f32.mrb[3].mxu1  ;;  %v2163_v13 = vmax.f32 %v3088_v0, 0.0  ;;  %v2165_v14 = vmax.f32 %v3092_v1, 0.0  ;;  %v2891_v8 = vld [vmem:[%s3807_s4] ss:$0 sm:$0xff] }
 0x1b6   :  { %v3091_v25 = vadd.f32 %v1824_v17, %v359_v60  ;;  %v3095_v12 = vadd.f32 %v1996_v11, %v367_v61  ;;  %v2164_v18 = vmax.f32 %v3089_v4, 0.0  ;;  %v2166_v19 = vmax.f32 %v3093_v6, 0.0 }
 0x1b7   :  { %v2168_v15 = vmax.f32 %v3090_v10, 0.0  ;;  %v2170_v16 = vmax.f32 %v3094_v9, 0.0 }
 0x1b8   :  { %v2169_v20 = vmax.f32 %v3091_v25, 0.0  ;;  %v2171_v21 = vmax.f32 %v3095_v12, 0.0 }
 0x1b9   :  { %v2173_v22 = vpack.c.bf16 %v2168_v15, %v2163_v13  ;;  %v2175_v23 = vpack.c.bf16 %v2170_v16, %v2165_v14 }
 0x1ba   :  { %v2174_v24 = vpack.c.bf16 %v2169_v20, %v2164_v18  ;;  %v2176_v27 = vpack.c.bf16 %v2171_v21, %v2166_v19 }
 0x1bc   :  { %2537 = vmatprep.mubr.bf16.mxu1 %v2174_v24  ;;  %2578 = vmatprep.mubr.bf16.mxu0 %v2176_v27 }
 0x1bd   :  { %2538 = vmatmul.mubr.bf16.vlgmr.msra.gmra.mrb[12].mxu1 %v2173_v22  ;;  %2579 = vmatmul.mubr.bf16.vlgmr.msra.gmra.mrb[12].mxu0 %v2175_v23 }
 0x1be   :  { %3069 = vmatpush3.bf16.msra.mxu1 %v3501_v28  ;;  %3084 = vmatprep.mubr.msk.bf16.mxu1 %vm3538_vm1, %v3537_v5 }
 0x1bf   :  { %3070 = vmatprep.subr.bf16.mxu1 %v3537_v5 }
 0x1c2   :  { %3071 = vmatpush3.bf16.msra.mxu1 %v3502_v29 }
 0x1c3   :  { %3072 = vmatprep.subr.bf16.mxu1 %v3537_v5 }
 0x1c6   :  { %3073 = vmatpush3.bf16.msra.mxu1 %v3503_v30 }
 0x1c7   :  { %3074 = vmatprep.subr.bf16.mxu1 %v3537_v5 }
 0x1ca   :  { %3075 = vmatpush3.bf16.msra.mxu1 %v3504_v31 }
 0x1cb   :  { %3076 = vmatprep.subr.bf16.mxu1 %v3537_v5 }
 0x1ce   :  { %3077 = vmatpush3.bf16.msra.mxu1 %v3505_v32 }
 0x1cf   :  { %3078 = vmatprep.subr.bf16.mxu1 %v3537_v5 }
 0x1d2   :  { %v2957_v35 = vpop.f32.mrb[4].mxu0  ;;  %v2979_v26 = vpop.f32.mrb[4].mxu1  ;;  %3079 = vmatpush3.bf16.msra.mxu1 %v3506_v34 }
 0x1d3   :  { %v2958_v39 = vpop.f32.mrb[5].mxu0  ;;  %v2980_v40 = vpop.f32.mrb[5].mxu1  ;;  %3080 = vmatprep.subr.bf16.mxu1 %v3537_v5 }
 0x1d4   :  { %v2959_v41 = vadd.f32 %v2958_v39, %v2957_v35  ;;  %v2960_v42 = vpop.f32.mrb[6].mxu0  ;;  %v2981_v43 = vadd.f32 %v2980_v40, %v2979_v26  ;;  %v2982_v44 = vpop.f32.mrb[6].mxu1 }
 0x1d5   :  { %v2961_v45 = vpop.f32.mrb[7].mxu0  ;;  %v2983_v46 = vpop.f32.mrb[7].mxu1 }
 0x1d6   :  { %v2034_v47 = vadd.f32 %v2959_v41, %v371_v37  ;;  %v2962_v48 = vadd.f32 %v2961_v45, %v2960_v42  ;;  %v2984_v49 = vadd.f32 %v2983_v46, %v2982_v44  ;;  %3081 = vmatpush3.bf16.msra.mxu1 %v3507_v38 }
 0x1d7   :  { %3082 = vmatprep.subr.bf16.mxu1 %v3537_v5 }
 0x1d8   :  { %v2037_v52 = vadd.f32 %v2962_v48, %v371_v37  ;;  %v2075_v53 = vadd.f32 %v2981_v43, %v2034_v47 }
 0x1da   :  { %v2078_v50 = vadd.f32 %v2984_v49, %v2037_v52  ;;  %v2156_v36 = vpop.f32.mrb[8].mxu1  ;;  %3083 = vmatpush3.bf16.msra.mxu1 %v3508_v51 }
 0x1db   :  { %v3066_v54 = vpop.f32.mrb[9].mxu1 }
 0x1dc   :  { %v2159_v55 = vpop.f32.mrb[10].mxu1 }
 0x1dd   :  { %v3067_v56 = vpop.f32.mrb[11].mxu1 }
 0x1f2   :  { %v3001_v57 = vpop.f32.mrb[8].mxu0 }
 0x1f3   :  { %v3002_v58 = vpop.f32.mrb[9].mxu0 }
 0x1f4   :  { %v3003_v59 = vadd.f32 %v3002_v58, %v3001_v57  ;;  %v3004_v60 = vpop.f32.mrb[10].mxu0 }
 0x1f5   :  { %v3005_v61 = vpop.f32.mrb[11].mxu0 }
 0x1f6   :  { %v3006_v62 = vadd.f32 %v3005_v61, %v3004_v60  ;;  %v2116_v63 = vadd.f32 %v3003_v59, %v2075_v53 }
 0x1f8   :  { %v2157_v0 = vadd.f32 %v2156_v36, %v2116_v63  ;;  %v2119_v1 = vadd.f32 %v3006_v62, %v2078_v50 }
 0x1fa   :  { %v2160_v2 = vadd.f32 %v2159_v55, %v2119_v1  ;;  %v2167_v3 = vmax.f32 %v2157_v0, 0.0 }
 0x1fc   :  { %v2172_v5 = vmax.f32 %v2160_v2, 0.0 }
 0x1fe   :  { %v2177_v4 = vpack.c.bf16 %v2172_v5, %v2167_v3 }
 0x200   :  { %3085 = vmatmul.mubr.bf16.vlgmr.msra.gmra.mrb[16].mxu1 %v2177_v4 }
 0x290   :  { %v3025_v6 = vpop.f32.mrb[12].mxu1  ;;  %v3047_v7 = vpop.f32.mrb[12].mxu0 }
 0x291   :  { %v3026_v10 = vpop.f32.mrb[13].mxu1  ;;  %v3048_v9 = vpop.f32.mrb[13].mxu0 }
 0x292   :  { %v3027_v17 = vadd.f32 %v3026_v10, %v3025_v6  ;;  %v3049_v11 = vadd.f32 %v3048_v9, %v3047_v7  ;;  %v3028_v25 = vpop.f32.mrb[14].mxu1  ;;  %v3050_v12 = vpop.f32.mrb[14].mxu0 }
 0x293   :  { %v3029_v13 = vpop.f32.mrb[15].mxu1  ;;  %v3051_v14 = vpop.f32.mrb[15].mxu0 }
 0x294   :  { %v2540_v15 = vadd.f32 %v3027_v17, %v2891_v8  ;;  %v3030_v16 = vadd.f32 %v3029_v13, %v3028_v25  ;;  %v3052_v18 = vadd.f32 %v3051_v14, %v3050_v12 }
 0x296   :  { %v2543_v19 = vadd.f32 %v3030_v16, %v2891_v8  ;;  %v2581_v20 = vadd.f32 %v3049_v11, %v2540_v15 }
 0x298   :  { %v2584_v21 = vadd.f32 %v3052_v18, %v2543_v19 }
 0x2d3   :  { %v2621_v22 = vpop.f32.mrb[16].mxu1 }
 0x2d4   :  { %v2622_v23 = vadd.f32 %v2621_v22, %v2581_v20  ;;  %v3086_v24 = vpop.f32.mrb[17].mxu1 }
 0x2d5   :  { %v2624_v27 = vpop.f32.mrb[18].mxu1 }
 0x2d6   :  { %v2625_v28 = vadd.f32 %v2624_v27, %v2584_v21  ;;  %v3087_v29 = vpop.f32.mrb[19].mxu1 }
 0x2d8   :  { %v2939_v30 = vpack.c.bf16 %v2625_v28, %v2622_v23 }
 0x2da   :  { %2940 = vst [vmem:[%s3808_s5] sm:$0xff] %v2939_v30  }
 0x2db   :  { %2642 = vsyncpa [#allocation3], 1 }

</bundles_post_ra>
